<compile_context>
chip_gen: v5e
topology: v5e:2x2
jax: 0.10.0
libtpu: 0.0.40
codegen_flags: <defaults>
</compile_context>

<pallas_src>
import jax
import jax.numpy as jnp
from jax.experimental import pallas as pl
from jax.experimental.pallas import tpu as pltpu
from jax.scipy.linalg import block_diag


# ----------------------------- Pallas kernel --------------------------------
def pyramid_kernel(
    x_ref,
    w1_ref, b1_ref,
    w2_ref, b2_ref,
    w3_ref, b3_ref,
    wf1_ref, wf2_ref, wf3_ref, bf_ref,
    o_ref,
):
    cdt = w1_ref.dtype                     # compute dtype for MXU operands (bf16)
    x = x_ref[...].astype(cdt)

    # layer1..3: Linear -> (folded BN) -> ReLU -> Dropout(eval = identity)
    x1 = jnp.maximum(
        jnp.dot(x, w1_ref[...], preferred_element_type=jnp.float32) + b1_ref[...], 0.0)
    x1c = x1.astype(cdt)
    x2 = jnp.maximum(
        jnp.dot(x1c, w2_ref[...], preferred_element_type=jnp.float32) + b2_ref[...], 0.0)
    x2c = x2.astype(cdt)
    x3 = jnp.maximum(
        jnp.dot(x2c, w3_ref[...], preferred_element_type=jnp.float32) + b3_ref[...], 0.0)
    x3c = x3.astype(cdt)

    # fusion: Linear over concat([x1, x2, x3], dim=1) as a sum of three matmuls
    # over the split weight (affine-free BN already folded into wf/bf).
    out = (
        jnp.dot(x1c, wf1_ref[...], preferred_element_type=jnp.float32)
        + jnp.dot(x2c, wf2_ref[...], preferred_element_type=jnp.float32)
        + jnp.dot(x3c, wf3_ref[...], preferred_element_type=jnp.float32)
        + bf_ref[...]
    )
    o_ref[...] = out.astype(o_ref.dtype)


# ------------------------ host-side param preparation -------------------------
def _fold_bn(w, b, s, t):
    """y = (x@w + b)*s + t  ==  x@(w*s) + (b*s + t)   (s, t are [1, d_out])."""
    return w * s, b * s + t


def _block_diag(w, pack):
    return block_diag(*([w] * pack)) if pack > 1 else w


def _tile_bias(b, pack):
    return jnp.tile(b, (1, pack)) if pack > 1 else b


def prepare_packed_params(params, pack, compute_dtype):
    """Fold eval-mode BN into the Linears, split the fusion weight at the concat
    boundaries, replicate block-diagonally so `pack` batch rows are processed
    per packed row, and cast weights to the MXU compute dtype (biases stay f32
    since they are added to the f32 accumulator)."""
    w1, b1 = _fold_bn(params["w1"], params["b1"], params["s1"], params["t1"])
    w2, b2 = _fold_bn(params["w2"], params["b2"], params["s2"], params["t2"])
    w3, b3 = _fold_bn(params["w3"], params["b3"], params["s3"], params["t3"])
    wf, bf = _fold_bn(params["wf"], params["bf"], params["sf"], params["tf"])

    d1, d2 = w1.shape[1], w2.shape[1]
    wf1, wf2, wf3 = wf[:d1, :], wf[d1:d1 + d2, :], wf[d1 + d2:, :]

    def wprep(w):
        return _block_diag(w, pack).astype(compute_dtype)

    def bprep(b):
        return _tile_bias(b, pack).astype(jnp.float32)

    return [
        wprep(w1), bprep(b1),
        wprep(w2), bprep(b2),
        wprep(w3), bprep(b3),
        wprep(wf1), wprep(wf2), wprep(wf3),
        bprep(bf),
    ]


def _round_up(x, m):
    return (x + m - 1) // m * m


def _cdiv(a, b):
    return (a + b - 1) // b


def _auto_pack(input_dim, feature_dim):
    """Smallest row-pack factor making both the packed input and output widths
    multiples of 128 lanes (lane-dense DMA / stores); fallback to the smallest
    pack that at least makes the *output* lane-dense (the bigger lever), else 1."""
    for p in range(1, 17):
        if (input_dim * p) % 128 == 0 and (feature_dim * p) % 128 == 0:
            return p
    for p in range(1, 17):
        if (feature_dim * p) % 128 == 0:
            return p
    return 1


# ------------------------------ wrapper --------------------------------------
def pyramid_network_pallas(x, params, *, feature_dim, tile_rows=16384, pack=None,
                           compute_dtype=jnp.bfloat16, out_dtype=None):
    """x: [N, input_dim]. params: raw (unfolded) parameter dict."""
    n, input_dim = x.shape
    out_dtype = x.dtype if out_dtype is None else out_dtype
    if pack is None:
        pack = _auto_pack(input_dim, feature_dim)

    # Pad only to the row quantum (8 packed sublanes); skip when already aligned.
    row_quantum = 8 * pack
    n_pad = _round_up(n, row_quantum)
    if n_pad != n:
        x = jnp.pad(x, ((0, n_pad - n), (0, 0)))
    n_packed = n_pad // pack

    packed_params = prepare_packed_params(params, pack, compute_dtype)

    # Same contiguous HBM bytes, viewed with `pack` batch rows per packed row.
    in_width = pack * input_dim
    out_width = pack * feature_dim
    x_packed = x.reshape(n_packed, in_width)

    # --- tile selection: big tiles for large batches, but grid >= 2 whenever
    #     possible so v7x megacore splits the batch across both TensorCores. ---
    tile_p_max = max(8, (tile_rows // pack) // 8 * 8)
    if n_packed > 2 * 8:
        tile_p = min(tile_p_max, _round_up(_cdiv(n_packed, 2), 8))
    else:
        tile_p = min(tile_p_max, n_packed)
    tile_p = max(8, tile_p)
    grid = (_cdiv(n_packed, tile_p),)

    batched = lambda i: (i, 0)               # activations: tiled along batch
    full = lambda i: (0, 0)                  # params: one full-array block

    in_specs = [pl.BlockSpec((tile_p, in_width), batched)]
    in_specs += [pl.BlockSpec(p.shape, full) for p in packed_params]
    out_spec = pl.BlockSpec((tile_p, out_width), batched)

    # --- cost estimate (block-diag packing inflates MXU flops by `pack`) ---
    layer_flops = input_dim * 16 + 16 * 12 + 12 * 8 + (16 + 12 + 8) * feature_dim
    param_bytes = sum(int(p.size) * p.dtype.itemsize for p in packed_params)
    cost = pl.CostEstimate(
        flops=int(2 * n_pad * pack * layer_flops),
        transcendentals=0,
        bytes_accessed=int(n_pad * input_dim * x.dtype.itemsize
                           + n_pad * feature_dim * jnp.dtype(out_dtype).itemsize
                           + param_bytes),
    )

    # --- VMEM limit: double-buffered in/out tiles + params + intermediates
    #     + margin (never the whole physical VMEM, which v7x would need). ---
    in_tile_b = tile_p * in_width * x.dtype.itemsize
    out_tile_b = tile_p * out_width * jnp.dtype(out_dtype).itemsize
    inter_b = tile_p * pack * (16 + 12 + 8) * (4 + jnp.dtype(compute_dtype).itemsize)
    vmem_limit = int(2 * (in_tile_b + out_tile_b) + param_bytes + 2 * inter_b
                     + (4 << 20))
    vmem_limit = max(vmem_limit, 8 << 20)

    out_packed = pl.pallas_call(
        pyramid_kernel,
        out_shape=jax.ShapeDtypeStruct((n_packed, out_width), out_dtype),
        grid_spec=pltpu.PrefetchScalarGridSpec(
            num_scalar_prefetch=0,
            grid=grid,
            in_specs=in_specs,
            out_specs=out_spec,
        ),
        compiler_params=pltpu.CompilerParams(
            dimension_semantics=("parallel",),   # megacore sharding on v7x
            vmem_limit_bytes=vmem_limit,
        ),
        cost_estimate=cost,
    )(x_packed, *packed_params)

    out = out_packed.reshape(n_pad, feature_dim)
    return out if n_pad == n else out[:n]


# ------------------------- parameter construction ----------------------------
def make_params(key, input_dim, feature_dim, eps=1e-5):
    """Deterministic synthetic parameters (eval-mode BN as scale/shift)."""
    ks = jax.random.split(key, 8)

    def lin(k, d_in, d_out):
        kw, kb = jax.random.split(k)
        w = jax.random.normal(kw, (d_in, d_out), jnp.float32) * 0.1   # [in, out]
        b = jax.random.normal(kb, (1, d_out), jnp.float32) * 0.1
        return w, b

    def bn_affine(k, d):
        kg, kb = jax.random.split(k)
        gamma = 1.0 + 0.1 * jax.random.normal(kg, (1, d), jnp.float32)
        beta = 0.1 * jax.random.normal(kb, (1, d), jnp.float32)
        running_mean = jnp.zeros((1, d), jnp.float32)
        running_var = jnp.ones((1, d), jnp.float32)
        s = gamma / jnp.sqrt(running_var + eps)
        t = beta - running_mean * s
        return s, t

    p = {}
    dims = [(input_dim, 16), (16, 12), (12, 8)]
    for i, (d_in, d_out) in enumerate(dims, start=1):
        p[f"w{i}"], p[f"b{i}"] = lin(ks[i - 1], d_in, d_out)
        p[f"s{i}"], p[f"t{i}"] = bn_affine(ks[i + 2], d_out)

    # fusion: Linear(36, feature_dim) + BatchNorm1d(feature_dim, affine=False)
    p["wf"], p["bf"] = lin(ks[6], 16 + 12 + 8, feature_dim)
    running_mean = jnp.zeros((1, feature_dim), jnp.float32)
    running_var = jnp.ones((1, feature_dim), jnp.float32)
    p["sf"] = 1.0 / jnp.sqrt(running_var + eps)
    p["tf"] = -running_mean * p["sf"]
    return p


# -------------------------- pure-JAX reference --------------------------------
def pyramid_network_ref(x, p):
    x1 = jnp.maximum((x @ p["w1"] + p["b1"]) * p["s1"] + p["t1"], 0.0)
    x2 = jnp.maximum((x1 @ p["w2"] + p["b2"]) * p["s2"] + p["t2"], 0.0)
    x3 = jnp.maximum((x2 @ p["w3"] + p["b3"]) * p["s3"] + p["t3"], 0.0)
    cat = jnp.concatenate([x1, x2, x3], axis=1)
    return (cat @ p["wf"] + p["bf"]) * p["sf"] + p["tf"]


# --------------------------------- main ---------------------------------------
if __name__ == "__main__":
    key = jax.random.PRNGKey(0)
    k_x, k_p = jax.random.split(key)

    # Small demo shapes (batch deliberately not a multiple of the row quantum to
    # exercise the padding / slice path).
    N, INPUT_DIM, FEATURE_DIM = 30, 32, 32

    x = jax.random.normal(k_x, (N, INPUT_DIM), jnp.float32)
    params = make_params(k_p, INPUT_DIM, FEATURE_DIM)

    out = pyramid_network_pallas(x, params, feature_dim=FEATURE_DIM)
    out = jax.block_until_ready(out)

    ref = pyramid_network_ref(x, params)
    assert out.shape == (N, FEATURE_DIM)
    # bf16 MXU operands with f32 accumulation: tolerance loosened vs. f32 ref.
    assert jnp.allclose(out, ref, atol=3e-2, rtol=3e-2), "mismatch vs reference"

    print("KERNEL_OK")
</pallas_src>

<mosaic_0001>
module attributes {stable_mosaic.version = 11 : i64} {
  func.func @pyramid_kernel(%arg0: i32, %arg1: memref<8x128xf32, #tpu.memory_space<vmem>>, %arg2: memref<128x64xbf16, #tpu.memory_space<vmem>>, %arg3: memref<1x64xf32, #tpu.memory_space<vmem>>, %arg4: memref<64x48xbf16, #tpu.memory_space<vmem>>, %arg5: memref<1x48xf32, #tpu.memory_space<vmem>>, %arg6: memref<48x32xbf16, #tpu.memory_space<vmem>>, %arg7: memref<1x32xf32, #tpu.memory_space<vmem>>, %arg8: memref<64x128xbf16, #tpu.memory_space<vmem>>, %arg9: memref<48x128xbf16, #tpu.memory_space<vmem>>, %arg10: memref<32x128xbf16, #tpu.memory_space<vmem>>, %arg11: memref<1x128xf32, #tpu.memory_space<vmem>>, %arg12: memref<8x128xf32, #tpu.memory_space<vmem>>) attributes {dimension_semantics = [#tpu.dimension_semantics<parallel>], iteration_bounds = array<i64: 1>, scalar_prefetch = 0 : i64, scratch_operands = 0 : i64, tpu.core_type = #tpu.core_type<tc>, window_params = [{transform_indices = @transform_0, window_bounds = array<i64: 8, 128>}, {pipeline_mode = #tpu.pipeline_mode<synchronous>, transform_indices = @transform_1, window_bounds = array<i64: 128, 64>}, {pipeline_mode = #tpu.pipeline_mode<synchronous>, transform_indices = @transform_2, window_bounds = array<i64: 1, 64>}, {pipeline_mode = #tpu.pipeline_mode<synchronous>, transform_indices = @transform_3, window_bounds = array<i64: 64, 48>}, {pipeline_mode = #tpu.pipeline_mode<synchronous>, transform_indices = @transform_4, window_bounds = array<i64: 1, 48>}, {pipeline_mode = #tpu.pipeline_mode<synchronous>, transform_indices = @transform_5, window_bounds = array<i64: 48, 32>}, {pipeline_mode = #tpu.pipeline_mode<synchronous>, transform_indices = @transform_6, window_bounds = array<i64: 1, 32>}, {pipeline_mode = #tpu.pipeline_mode<synchronous>, transform_indices = @transform_7, window_bounds = array<i64: 64, 128>}, {pipeline_mode = #tpu.pipeline_mode<synchronous>, transform_indices = @transform_8, window_bounds = array<i64: 48, 128>}, {pipeline_mode = #tpu.pipeline_mode<synchronous>, transform_indices = @transform_9, window_bounds = array<i64: 32, 128>}, {pipeline_mode = #tpu.pipeline_mode<synchronous>, transform_indices = @transform_10, window_bounds = array<i64: 1, 128>}, {transform_indices = @transform_11, window_bounds = array<i64: 8, 128>}]} {
    %c0 = arith.constant 0 : index
    %c0_0 = arith.constant 0 : index
    %0 = vector.load %arg1[%c0, %c0_0] : memref<8x128xf32, #tpu.memory_space<vmem>>, vector<8x128xf32>
    %1 = arith.truncf %0 : vector<8x128xf32> to vector<8x128xbf16>
    %c0_1 = arith.constant 0 : index
    %c0_2 = arith.constant 0 : index
    %2 = vector.load %arg2[%c0_1, %c0_2] : memref<128x64xbf16, #tpu.memory_space<vmem>>, vector<128x64xbf16>
    %cst = arith.constant dense<0.000000e+00> : vector<8x64xf32>
    %3 = tpu.matmul %1, %2, %cst {dimension_numbers = #tpu.dot_dimension_numbers<[1], [0], [0], [1], [0, 0, 1, 1], [], []>} : vector<8x128xbf16>, vector<128x64xbf16>, vector<8x64xf32> -> vector<8x64xf32>
    %c0_3 = arith.constant 0 : index
    %c0_4 = arith.constant 0 : index
    %4 = vector.load %arg3[%c0_3, %c0_4] : memref<1x64xf32, #tpu.memory_space<vmem>>, vector<1x64xf32>
    %5 = vector.broadcast %4 : vector<1x64xf32> to vector<8x64xf32>
    %6 = arith.addf %3, %5 : vector<8x64xf32>
    %cst_5 = arith.constant 0.000000e+00 : f32
    %7 = vector.broadcast %cst_5 : f32 to vector<8x64xf32>
    %8 = arith.maximumf %6, %7 : vector<8x64xf32>
    %9 = arith.truncf %8 : vector<8x64xf32> to vector<8x64xbf16>
    %c0_6 = arith.constant 0 : index
    %c0_7 = arith.constant 0 : index
    %10 = vector.load %arg4[%c0_6, %c0_7] : memref<64x48xbf16, #tpu.memory_space<vmem>>, vector<64x48xbf16>
    %cst_8 = arith.constant dense<0.000000e+00> : vector<8x48xf32>
    %11 = tpu.matmul %9, %10, %cst_8 {dimension_numbers = #tpu.dot_dimension_numbers<[1], [0], [0], [1], [0, 0, 1, 1], [], []>} : vector<8x64xbf16>, vector<64x48xbf16>, vector<8x48xf32> -> vector<8x48xf32>
    %c0_9 = arith.constant 0 : index
    %c0_10 = arith.constant 0 : index
    %12 = vector.load %arg5[%c0_9, %c0_10] : memref<1x48xf32, #tpu.memory_space<vmem>>, vector<1x48xf32>
    %13 = vector.broadcast %12 : vector<1x48xf32> to vector<8x48xf32>
    %14 = arith.addf %11, %13 : vector<8x48xf32>
    %cst_11 = arith.constant 0.000000e+00 : f32
    %15 = vector.broadcast %cst_11 : f32 to vector<8x48xf32>
    %16 = arith.maximumf %14, %15 : vector<8x48xf32>
    %17 = arith.truncf %16 : vector<8x48xf32> to vector<8x48xbf16>
    %c0_12 = arith.constant 0 : index
    %c0_13 = arith.constant 0 : index
    %18 = vector.load %arg6[%c0_12, %c0_13] : memref<48x32xbf16, #tpu.memory_space<vmem>>, vector<48x32xbf16>
    %cst_14 = arith.constant dense<0.000000e+00> : vector<8x32xf32>
    %19 = tpu.matmul %17, %18, %cst_14 {dimension_numbers = #tpu.dot_dimension_numbers<[1], [0], [0], [1], [0, 0, 1, 1], [], []>} : vector<8x48xbf16>, vector<48x32xbf16>, vector<8x32xf32> -> vector<8x32xf32>
    %c0_15 = arith.constant 0 : index
    %c0_16 = arith.constant 0 : index
    %20 = vector.load %arg7[%c0_15, %c0_16] : memref<1x32xf32, #tpu.memory_space<vmem>>, vector<1x32xf32>
    %21 = vector.broadcast %20 : vector<1x32xf32> to vector<8x32xf32>
    %22 = arith.addf %19, %21 : vector<8x32xf32>
    %cst_17 = arith.constant 0.000000e+00 : f32
    %23 = vector.broadcast %cst_17 : f32 to vector<8x32xf32>
    %24 = arith.maximumf %22, %23 : vector<8x32xf32>
    %25 = arith.truncf %24 : vector<8x32xf32> to vector<8x32xbf16>
    %c0_18 = arith.constant 0 : index
    %c0_19 = arith.constant 0 : index
    %26 = vector.load %arg8[%c0_18, %c0_19] : memref<64x128xbf16, #tpu.memory_space<vmem>>, vector<64x128xbf16>
    %cst_20 = arith.constant dense<0.000000e+00> : vector<8x128xf32>
    %27 = tpu.matmul %9, %26, %cst_20 {dimension_numbers = #tpu.dot_dimension_numbers<[1], [0], [0], [1], [0, 0, 1, 1], [], []>} : vector<8x64xbf16>, vector<64x128xbf16>, vector<8x128xf32> -> vector<8x128xf32>
    %c0_21 = arith.constant 0 : index
    %c0_22 = arith.constant 0 : index
    %28 = vector.load %arg9[%c0_21, %c0_22] : memref<48x128xbf16, #tpu.memory_space<vmem>>, vector<48x128xbf16>
    %cst_23 = arith.constant dense<0.000000e+00> : vector<8x128xf32>
    %29 = tpu.matmul %17, %28, %cst_23 {dimension_numbers = #tpu.dot_dimension_numbers<[1], [0], [0], [1], [0, 0, 1, 1], [], []>} : vector<8x48xbf16>, vector<48x128xbf16>, vector<8x128xf32> -> vector<8x128xf32>
    %30 = arith.addf %27, %29 : vector<8x128xf32>
    %c0_24 = arith.constant 0 : index
    %c0_25 = arith.constant 0 : index
    %31 = vector.load %arg10[%c0_24, %c0_25] : memref<32x128xbf16, #tpu.memory_space<vmem>>, vector<32x128xbf16>
    %cst_26 = arith.constant dense<0.000000e+00> : vector<8x128xf32>
    %32 = tpu.matmul %25, %31, %cst_26 {dimension_numbers = #tpu.dot_dimension_numbers<[1], [0], [0], [1], [0, 0, 1, 1], [], []>} : vector<8x32xbf16>, vector<32x128xbf16>, vector<8x128xf32> -> vector<8x128xf32>
    %33 = arith.addf %30, %32 : vector<8x128xf32>
    %c0_27 = arith.constant 0 : index
    %c0_28 = arith.constant 0 : index
    %34 = vector.load %arg11[%c0_27, %c0_28] : memref<1x128xf32, #tpu.memory_space<vmem>>, vector<1x128xf32>
    %35 = vector.broadcast %34 : vector<1x128xf32> to vector<8x128xf32>
    %36 = arith.addf %33, %35 : vector<8x128xf32>
    %c0_29 = arith.constant 0 : index
    %c0_30 = arith.constant 0 : index
    %37 = vector.load %arg12[%c0_29, %c0_30] : memref<8x128xf32, #tpu.memory_space<vmem>>, vector<8x128xf32>
    tpu.vector_store %arg12[%c0_29, %c0_30], %36 {strides = array<i32>} : memref<8x128xf32, #tpu.memory_space<vmem>>, vector<8x128xf32>,
    return
  }
  func.func @transform_0(%arg0: i32) -> (i32, i32) {
    %c0_i32 = arith.constant 0 : i32
    %c0_i32_0 = arith.constant 0 : i32
    return %arg0, %c0_i32 : i32, i32
  }
  func.func @transform_1(%arg0: i32) -> (i32, i32) {
    %c0_i32 = arith.constant 0 : i32
    %c0_i32_0 = arith.constant 0 : i32
    %c0_i32_1 = arith.constant 0 : i32
    return %c0_i32, %c0_i32_0 : i32, i32
  }
  func.func @transform_2(%arg0: i32) -> (i32, i32) {
    %c0_i32 = arith.constant 0 : i32
    %c0_i32_0 = arith.constant 0 : i32
    %c0_i32_1 = arith.constant 0 : i32
    return %c0_i32, %c0_i32_0 : i32, i32
  }
  func.func @transform_3(%arg0: i32) -> (i32, i32) {
    %c0_i32 = arith.constant 0 : i32
    %c0_i32_0 = arith.constant 0 : i32
    %c0_i32_1 = arith.constant 0 : i32
    return %c0_i32, %c0_i32_0 : i32, i32
  }
  func.func @transform_4(%arg0: i32) -> (i32, i32) {
    %c0_i32 = arith.constant 0 : i32
    %c0_i32_0 = arith.constant 0 : i32
    %c0_i32_1 = arith.constant 0 : i32
    return %c0_i32, %c0_i32_0 : i32, i32
  }
  func.func @transform_5(%arg0: i32) -> (i32, i32) {
    %c0_i32 = arith.constant 0 : i32
    %c0_i32_0 = arith.constant 0 : i32
    %c0_i32_1 = arith.constant 0 : i32
    return %c0_i32, %c0_i32_0 : i32, i32
  }
  func.func @transform_6(%arg0: i32) -> (i32, i32) {
    %c0_i32 = arith.constant 0 : i32
    %c0_i32_0 = arith.constant 0 : i32
    %c0_i32_1 = arith.constant 0 : i32
    return %c0_i32, %c0_i32_0 : i32, i32
  }
  func.func @transform_7(%arg0: i32) -> (i32, i32) {
    %c0_i32 = arith.constant 0 : i32
    %c0_i32_0 = arith.constant 0 : i32
    %c0_i32_1 = arith.constant 0 : i32
    return %c0_i32, %c0_i32_0 : i32, i32
  }
  func.func @transform_8(%arg0: i32) -> (i32, i32) {
    %c0_i32 = arith.constant 0 : i32
    %c0_i32_0 = arith.constant 0 : i32
    %c0_i32_1 = arith.constant 0 : i32
    return %c0_i32, %c0_i32_0 : i32, i32
  }
  func.func @transform_9(%arg0: i32) -> (i32, i32) {
    %c0_i32 = arith.constant 0 : i32
    %c0_i32_0 = arith.constant 0 : i32
    %c0_i32_1 = arith.constant 0 : i32
    return %c0_i32, %c0_i32_0 : i32, i32
  }
  func.func @transform_10(%arg0: i32) -> (i32, i32) {
    %c0_i32 = arith.constant 0 : i32
    %c0_i32_0 = arith.constant 0 : i32
    %c0_i32_1 = arith.constant 0 : i32
    return %c0_i32, %c0_i32_0 : i32, i32
  }
  func.func @transform_11(%arg0: i32) -> (i32, i32) {
    %c0_i32 = arith.constant 0 : i32
    %c0_i32_0 = arith.constant 0 : i32
    return %arg0, %c0_i32 : i32, i32
  }
}

</mosaic_0001>

<bundles_post_ra>
// kernel: tpu_custom_call.1
= control target key start
LH: loop header
LB: loop body
LE: loop exit
PB: predicated region body
PF: predicated region fallthrough
CT: control target
= control target key end

     0   :  { %s674_s0 = inlined_call_operand.vmem [shape: f32[8,128], index: 0, kind: input, shape index: {}]   ;;  %s675_s1 = inlined_call_operand.vmem [shape: bf16[128,64], index: 1, kind: input, shape index: {}]   ;;  %s676_s2 = inlined_call_operand.vmem [shape: f32[1,64], index: 2, kind: input, shape index: {}]   ;;  %s677_s3 = inlined_call_operand.vmem [shape: bf16[64,48], index: 3, kind: input, shape index: {}]   ;;  %s678_s4 = inlined_call_operand.vmem [shape: f32[1,48], index: 4, kind: input, shape index: {}]   ;;  %s679_s5 = inlined_call_operand.vmem [shape: bf16[48,32], index: 5, kind: input, shape index: {}]   ;;  %s680_s6 = inlined_call_operand.vmem [shape: f32[1,32], index: 6, kind: input, shape index: {}]   ;;  %s681_s7 = inlined_call_operand.vmem [shape: bf16[64,128], index: 7, kind: input, shape index: {}]   ;;  %s682_s8 = inlined_call_operand.vmem [shape: bf16[48,128], index: 8, kind: input, shape index: {}]   ;;  %s683_s9 = inlined_call_operand.vmem [shape: bf16[32,128], index: 9, kind: input, shape index: {}]   ;;  %s684_s10 = inlined_call_operand.vmem [shape: f32[1,128], index: 10, kind: input, shape index: {}]   ;;  %s685_s11 = inlined_call_operand.hbm [shape: f32[8,128], index: 11, kind: output, shape index: {}]  }
   0x1   :  { %v473_v0 = vld [vmem:[%s675_s1 + $0x38] sm:$0xff]  ;;  %v472_v1 = vld [vmem:[%s675_s1 + $0x30] sm:$0xff] }
   0x2   :  { %110 = vmatpush.bf16.msra.mxu0 %v473_v0  ;;  %v477_v2 = vld [vmem:[%s677_s3 + $0x18] sm:$0xff]  ;;  %v476_v3 = vld [vmem:[%s677_s3 + $0x10] sm:$0xff] }
   0x3   :  { %169 = vmatpush.bf16.msra.mxu1 %v477_v2 }
   0x4   :  { %16 = vsyncpa [#allocation3], 0  ;;  %v471_v4 = vld [vmem:[%s675_s1 + $0x28] sm:$0xff]  ;;  %v470_v5 = vld [vmem:[%s675_s1 + $0x20] sm:$0xff]  ;;  %vm161_vm0 = vcmask 523264   ;;  %vm208_vm1 = vcmask 392192  }
   0x5   :  { %v469_v6 = vld [vmem:[%s675_s1 + $0x18] sm:$0xff]  ;;  %v468_v7 = vld [vmem:[%s675_s1 + $0x10] sm:$0xff]  ;;  %v467_v8 = vld [vmem:[%s675_s1 + $0x8] sm:$0xff]  ;;  %vm325_vm2 = vcmask 261120   ;;  %s356_s28 = sshll.u32 %s685_s11, 4  ;;  %s357_s28 = int_to_ptr.hbm [resolvable:$true] %s356_s28 }
   0x6   :  { %111 = vmatpush.bf16.msra.mxu0 %v472_v1  ;;  %v466_v9 = vld [vmem:[%s675_s1] sm:$0xff]  ;;  %v475_v12 = vld [vmem:[%s677_s3 + $0x8] sm:$0xff]  ;;  %v480_v14 = vld [vmem:[%s679_s5 + $0x10] sm:$0xff] }
   0x7   :  { %170 = vmatpush.bf16.msra.mxu1 %v476_v3  ;;  %v40_v10 = vld [vmem:[%s674_s0] sm:$0xff]  ;;  %v487_v15 = vld [vmem:[%s682_s8 + $0x10] sm:$0xff]  ;;  %217 = vmatpush.bf16.msra.mxu2 %v480_v14  ;;  %v479_v22 = vld [vmem:[%s679_s5 + $0x8] sm:$0xff]  ;;  %s521_s0 = smov [#allocation2]  }
   0x8   :  { %v41_v11 = vpack.c.bf16 %v40_v10, %v40_v10  ;;  %v474_v13 = vld [vmem:[%s677_s3] sm:$0xff]  ;;  %264 = vmatpush.bf16.msra.mxu3 %v487_v15  ;;  %v486_v23 = vld [vmem:[%s682_s8 + $0x8] sm:$0xff]  ;;  %v484_v26 = vld [vmem:[%s681_s7 + $0x18] sm:$0xff]  ;;  %s354_s27 = sshll.u32 %s521_s0, 4  ;;  %s355_s27 = int_to_ptr.vmem [resolvable:$true] %s354_s27 }
   0x9   :  { %v491_v16 = vld [vmem:[%s676_s2] ss:$0 sm:$0xff]  ;;  %v483_v27 = vld [vmem:[%s681_s7 + $0x10] sm:$0xff]  ;;  %v482_v28 = vld [vmem:[%s681_s7 + $0x8] sm:$0xff] }
   0xa   :  { %112 = vmatpush.bf16.msra.mxu0 %v471_v4  ;;  %v478_v24 = vld [vmem:[%s679_s5] sm:$0xff]  ;;  %v489_v30 = vld [vmem:[%s683_s9 + $0x8] sm:$0xff] }
   0xb   :  { %171 = vmatpush.bf16.msra.mxu1 %v475_v12  ;;  %218 = vmatpush.bf16.msra.mxu2 %v479_v22  ;;  %v485_v25 = vld [vmem:[%s682_s8] sm:$0xff] }
   0xc   :  { %265 = vmatpush.bf16.msra.mxu3 %v486_v23  ;;  %v481_v29 = vld [vmem:[%s681_s7] sm:$0xff] }
   0xd   :  { %v488_v31 = vld [vmem:[%s683_s9] sm:$0xff] }
   0xe   :  { %113 = vmatpush.bf16.msra.mxu0 %v470_v5  ;;  %v492_v32 = vld [vmem:[%s678_s4] ss:$0 sm:$0xff] }
   0xf   :  { %172 = vmatpush.bf16.msra.mxu1 %v474_v13  ;;  %219 = vmatpush.bf16.msra.mxu2 %v478_v24  ;;  %v493_v38 = vld [vmem:[%s680_s6] ss:$0 sm:$0xff] }
  0x10   :  { %266 = vmatpush.bf16.msra.mxu3 %v485_v25  ;;  %v494_v49 = vld [vmem:[%s684_s10] ss:$0 sm:$0xff] }
  0x12   :  { %114 = vmatpush.bf16.msra.mxu0 %v469_v6 }
  0x13   :  { %300 = vmatpush.bf16.msrb.mxu2 %v484_v26 }
  0x14   :  { %335 = vmatpush.bf16.msrb.mxu3 %v489_v30 }
  0x16   :  { %115 = vmatpush.bf16.msra.mxu0 %v468_v7 }
  0x17   :  { %301 = vmatpush.bf16.msrb.mxu2 %v483_v27 }
  0x18   :  { %336 = vmatpush.bf16.msrb.mxu3 %v488_v31 }
  0x1a   :  { %116 = vmatpush.bf16.msra.mxu0 %v467_v8 }
  0x1b   :  { %302 = vmatpush.bf16.msrb.mxu2 %v482_v28 }
  0x1e   :  { %117 = vmatpush.bf16.msra.mxu0 %v466_v9 }
  0x1f   :  { %303 = vmatpush.bf16.msrb.mxu2 %v481_v29 }
  0x21   :  { %118 = vmatmul.bf16.vlgmr.msra.gmra.mxu0 %v41_v11 }
  0x9e   :  { %v119_v17 = vpop.f32.mrf.mxu0 }
  0x9f   :  { %v120_v18 = vadd.f32 %v491_v16, %v119_v17 }
  0xa1   :  { %v123_v19 = vmax.f32 %v120_v18, 0.0 }
  0xa3   :  { %v124_v20 = vpack.c.bf16 %v123_v19, %v123_v19 }
  0xa5   :  { %413 = vmatmul.msk.bf16.vlgmr.msra.gmra.mxu1 %vm161_vm0, %v124_v20 }
  0xa6   :  { %v121_v21 = vpop.f32.mrf.mxu0 }
 0x122   :  { %v174_v33 = vpop.f32.mrf.mxu1 }
 0x123   :  { %v175_v34 = vadd.f32 %v492_v32, %v174_v33 }
 0x125   :  { %v178_v35 = vmax.f32 %v175_v34, 0.0 }
 0x127   :  { %v179_v36 = vpack.c.bf16 %v178_v35, %v178_v35 }
 0x129   :  { %426 = vmatmul.msk.bf16.vlgmr.msra.gmra.mxu2 %vm208_vm1, %v179_v36  ;;  %439 = vmatmul.msk.bf16.vlgmr.msra.gmra.mxu3 %vm208_vm1, %v179_v36 }
 0x12a   :  { %v176_v37 = vpop.f32.mrf.mxu1 }
 0x139   :  { %456 = vmatmul.msk.bf16.vlgmr.msrb.gmra.mxu2 %vm161_vm0, %v124_v20 }
 0x1ac   :  { %v221_v39 = vpop.f32.mrf.mxu2  ;;  %v268_v40 = vpop.f32.mrf.mxu3 }
 0x1ad   :  { %v222_v41 = vadd.f32 %v493_v38, %v221_v39 }
 0x1af   :  { %v225_v42 = vmax.f32 %v222_v41, 0.0 }
 0x1b1   :  { %v226_v43 = vpack.c.bf16 %v225_v42, %v225_v42 }
 0x1b3   :  { %465 = vmatmul.msk.bf16.vlgmr.msrb.gmra.mxu3 %vm325_vm2, %v226_v43 }
 0x1b4   :  { %v223_v44 = vpop.f32.mrf.mxu2  ;;  %v270_v45 = vpop.f32.mrf.mxu3 }
 0x1bc   :  { %v305_v46 = vpop.f32.mrf.mxu2 }
 0x1bd   :  { %v306_v47 = vadd.f32 %v305_v46, %v268_v40 }
 0x1c4   :  { %v307_v48 = vpop.f32.mrf.mxu2 }
 0x236   :  { %v338_v50 = vpop.f32.mrf.mxu3 }
 0x237   :  { %v342_v51 = vadd.f32 %v338_v50, %v306_v47 }
 0x239   :  { %v347_v52 = vadd.f32 %v494_v49, %v342_v51 }
 0x23b   :  { %348 = vst [vmem:[#allocation2] sm:$0xff] %v347_v52 }
 0x23c   :  { %359 = dma.vmem_to_hbm [thread:$0]  %s355_s27, 128, %s357_s28, [#allocation3]  }
 0x23e   :  { %v340_v53 = vpop.f32.mrf.mxu3 }
 0x23f   :  { %519 = dma.done.wait [#allocation3], 128  }
 0x240   :  { %520 = vsyncadd [#allocation3], 4294967168 }
 0x241   :  { %364 = vsyncpa [#allocation3], 1 }

</bundles_post_ra>
